<compile_context>
chip_gen: v7x
topology: tpu7x:2x2x1
jax: 0.10.0
libtpu: 0.0.40
codegen_flags: <defaults>
</compile_context>

<pallas_src>
import functools

import jax
import jax.numpy as jnp
import numpy as np
from jax import lax
from jax.experimental import pallas as pl
from jax.experimental.pallas import tpu as pltpu

LANE = 128
SUBLANE = 8


def _round_up(x, m):
    return (x + m - 1) // m * m


def _pad2(a, rows, cols):
    out = jnp.zeros((rows, cols), a.dtype)
    return out.at[: a.shape[0], : a.shape[1]].set(a)


def _pad3(a, d0, d1, d2):
    out = jnp.zeros((d0, d1, d2), a.dtype)
    return out.at[: a.shape[0], : a.shape[1], : a.shape[2]].set(a)


def _pad_idx_col(idx, rows):
    # Padded entries are -1 -> their one-hot rows/cols are all-zero inside the kernel.
    out = jnp.full((rows, 1), -1, jnp.int32)
    return out.at[: idx.shape[0], 0].set(idx.astype(jnp.int32))


# ----------------------------- Pallas kernel --------------------------------
def mpnn_kernel(num_layers,
                # int32 index inputs (VMEM column vectors)
                esrc_ref, etgt_ref, batch_ref,
                # feature / weight inputs (VMEM)
                x_ref, ef_ref,
                w_ee_ref, b_ee_ref, w_in_ref, b_in_ref,
                w_gc_ref, b_gc_ref, w_out_ref, b_out_ref,
                # output
                out_ref,
                # VMEM scratch: per-layer node state
                x_s):
    f32 = jnp.float32
    Ep = ef_ref.shape[0]
    Np, Hp = x_s.shape
    Bp = out_ref.shape[0]

    # One-hot gather / scatter / readout matrices, built once and reused per layer.
    node_iota = lax.broadcasted_iota(jnp.int32, (Ep, Np), 1)
    gmat = (esrc_ref[...] == node_iota).astype(f32)       # (Ep, Np) gather src rows
    smat_t = (etgt_ref[...] == node_iota).astype(f32)     # (Ep, Np) scatter^T to tgt
    graph_iota = lax.broadcasted_iota(jnp.int32, (Np, Bp), 1)
    rmat_t = (batch_ref[...] == graph_iota).astype(f32)   # (Np, Bp) readout^T

    # EdgeEncoderMLP: ef = relu(EF @ W_ee + b_ee)          (Ep, Hp)
    ef_emb = jnp.maximum(
        jnp.dot(ef_ref[...], w_ee_ref[...], preferred_element_type=f32)
        + b_ee_ref[...], 0.0)

    # input nn.Linear (no activation): x = X @ W_in + b_in  (Np, Hp)
    x_s[...] = (jnp.dot(x_ref[...], w_in_ref[...], preferred_element_type=f32)
                + b_in_ref[...])

    # message-passing layers (static unroll; state kept in VMEM scratch x_s)
    for l in range(num_layers):
        support = (jnp.dot(x_s[...], w_gc_ref[l], preferred_element_type=f32)
                   + b_gc_ref[l])                                        # (Np, Hp)
        gathered = jnp.dot(gmat, support, preferred_element_type=f32)    # (Ep, Hp)
        msgs = ef_emb * gathered                                         # (Ep, Hp)
        # scatter-add: acc[n] = sum_{e: etgt[e]==n} msgs[e]  == smat_t^T @ msgs
        acc = lax.dot_general(smat_t, msgs, (((0,), (0,)), ((), ())),
                              preferred_element_type=f32)                # (Np, Hp)
        # ReLU between message-passing steps, none after the last (assumed semantics).
        x_s[...] = jnp.maximum(acc, 0.0) if l < num_layers - 1 else acc

    # output nn.Linear (no activation; output_function = identity)
    node_out = (jnp.dot(x_s[...], w_out_ref[...], preferred_element_type=f32)
                + b_out_ref[...])                                        # (Np, Hp)

    # graph readout: scatter_add over `batch` as one-hot matmul -> single lane-dense
    # full-width store into out_ref.
    out_ref[...] = lax.dot_general(rmat_t, node_out, (((0,), (0,)), ((), ())),
                                   preferred_element_type=f32)           # (Bp, Hp)


# ------------------------------ wrapper --------------------------------------
def mpnn_forward(node_feats, edge_feats, esrc_idx, etgt_idx, batch_idx,
                 params, num_graphs):
    N, Fn = node_feats.shape
    E, Fe = edge_feats.shape
    L, H, _ = params["w_gc"].shape
    T = params["w_out"].shape[1]

    Np = _round_up(max(N, SUBLANE), SUBLANE)
    Ep = _round_up(max(E, SUBLANE), SUBLANE)
    Fnp = _round_up(Fn, LANE)
    Fep = _round_up(Fe, LANE)
    Hp = _round_up(H, LANE)
    Bp = _round_up(max(num_graphs, SUBLANE), SUBLANE)
    assert T <= Hp

    # Lane-dense, zero-padded operands (padding is mathematically inert: padded
    # weight rows/cols and biases are zero; padded node/edge/graph rows are masked
    # out by the -1 padded index entries of the one-hot matrices).
    x_p = _pad2(node_feats.astype(jnp.float32), Np, Fnp)
    ef_p = _pad2(edge_feats.astype(jnp.float32), Ep, Fep)
    w_ee = _pad2(params["w_ee"], Fep, Hp)
    b_ee = _pad2(params["b_ee"], 1, Hp)
    w_in = _pad2(params["w_in"], Fnp, Hp)
    b_in = _pad2(params["b_in"], 1, Hp)
    w_gc = _pad3(params["w_gc"], L, Hp, Hp)
    b_gc = _pad3(params["b_gc"], L, 1, Hp)
    w_out = _pad2(params["w_out"], Hp, Hp)   # target dim padded to full lanes
    b_out = _pad2(params["b_out"], 1, Hp)

    esrc_p = _pad_idx_col(esrc_idx, Ep)
    etgt_p = _pad_idx_col(etgt_idx, Ep)
    batch_p = _pad_idx_col(batch_idx, Np)

    def im2(i):
        return (0, 0)

    def im3(i):
        return (0, 0, 0)

    in_specs = [
        pl.BlockSpec((Ep, 1), im2),        # esrc
        pl.BlockSpec((Ep, 1), im2),        # etgt
        pl.BlockSpec((Np, 1), im2),        # batch
        pl.BlockSpec((Np, Fnp), im2),      # node features
        pl.BlockSpec((Ep, Fep), im2),      # edge features
        pl.BlockSpec((Fep, Hp), im2),      # W_ee
        pl.BlockSpec((1, Hp), im2),        # b_ee
        pl.BlockSpec((Fnp, Hp), im2),      # W_in
        pl.BlockSpec((1, Hp), im2),        # b_in
        pl.BlockSpec((L, Hp, Hp), im3),    # W_gc
        pl.BlockSpec((L, 1, Hp), im3),     # b_gc
        pl.BlockSpec((Hp, Hp), im2),       # W_out
        pl.BlockSpec((1, Hp), im2),        # b_out
    ]

    in_bytes = 4 * (x_p.size + ef_p.size + w_ee.size + b_ee.size + w_in.size
                    + b_in.size + w_gc.size + b_gc.size + w_out.size + b_out.size
                    + esrc_p.size + etgt_p.size + batch_p.size)
    work_bytes = 4 * (Np * Hp            # x_s scratch
                      + Ep * Hp          # edge embeddings
                      + 2 * Ep * Np      # gather / scatter one-hots
                      + Np * Bp          # readout one-hot
                      + Bp * Hp)         # output
    # Budget against v7x's 64 MiB VMEM with headroom; tiny inputs still get 16 MiB.
    vmem_limit = int(min(max(2 * in_bytes + 2 * work_bytes + (4 << 20), 16 << 20),
                         48 << 20))

    flops = int(
        2 * Ep * Fep * Hp + 2 * Np * Fnp * Hp                  # encoders / input linear
        + L * (2 * Np * Hp * Hp                                # support matmul
               + 2 * Ep * Np * Hp + Ep * Hp                    # one-hot gather + gate
               + 2 * Np * Ep * Hp)                             # one-hot scatter-add
        + 2 * Np * Hp * Hp                                     # output linear
        + 2 * Bp * Np * Hp)                                    # one-hot readout
    bytes_accessed = int(in_bytes + 4 * Bp * Hp)

    kernel = functools.partial(mpnn_kernel, int(L))

    out = pl.pallas_call(
        kernel,
        grid=(1,),
        in_specs=in_specs,
        out_specs=pl.BlockSpec((Bp, Hp), im2),
        out_shape=jax.ShapeDtypeStruct((Bp, Hp), jnp.float32),
        scratch_shapes=[pltpu.VMEM((Np, Hp), jnp.float32)],    # node state
        compiler_params=pltpu.CompilerParams(
            dimension_semantics=("arbitrary",),
            vmem_limit_bytes=vmem_limit),
        cost_estimate=pl.CostEstimate(flops=flops, transcendentals=0,
                                      bytes_accessed=bytes_accessed),
    )(esrc_p, etgt_p, batch_p,
      x_p, ef_p, w_ee, b_ee, w_in, b_in, w_gc, b_gc, w_out, b_out)

    return out[:num_graphs, :T]


# ------------------------- pure-JAX reference --------------------------------
def mpnn_reference(node_feats, edge_feats, esrc_idx, etgt_idx, batch_idx,
                   params, num_graphs):
    ef = jax.nn.relu(edge_feats @ params["w_ee"] + params["b_ee"])
    x = node_feats @ params["w_in"] + params["b_in"]
    L = params["w_gc"].shape[0]
    for l in range(L):
        support = x @ params["w_gc"][l] + params["b_gc"][l]
        msgs = ef * support[esrc_idx]
        x_new = jnp.zeros_like(x).at[etgt_idx].add(msgs)
        x = jax.nn.relu(x_new) if l < L - 1 else x_new
    x = x @ params["w_out"] + params["b_out"]
    out = jnp.zeros((num_graphs, x.shape[1]), x.dtype).at[batch_idx].add(x)
    return out   # output_function = identity


# ------------------------------ params ---------------------------------------
def init_params(key, node_f, edge_f, hidden, target_f, num_layers):
    ks = jax.random.split(key, 8)
    s = 0.1
    return dict(
        w_ee=s * jax.random.normal(ks[0], (edge_f, hidden), jnp.float32),
        b_ee=s * jax.random.normal(ks[1], (1, hidden), jnp.float32),
        w_in=s * jax.random.normal(ks[2], (node_f, hidden), jnp.float32),
        b_in=s * jax.random.normal(ks[3], (1, hidden), jnp.float32),
        w_gc=s * jax.random.normal(ks[4], (num_layers, hidden, hidden), jnp.float32),
        b_gc=s * jax.random.normal(ks[5], (num_layers, 1, hidden), jnp.float32),
        w_out=s * jax.random.normal(ks[6], (hidden, target_f), jnp.float32),
        b_out=s * jax.random.normal(ks[7], (1, target_f), jnp.float32),
    )


if __name__ == "__main__":
    # Small, deterministic problem: 2 graphs of 6 nodes each.
    N, E = 12, 24
    NODE_F, EDGE_F, HIDDEN, TARGET_F, NUM_LAYERS = 6, 4, 73, 1, 3
    NUM_GRAPHS = 2

    key = jax.random.PRNGKey(0)
    k_nf, k_ef, k_src, k_tgt, k_par = jax.random.split(key, 5)

    node_feats = jax.random.normal(k_nf, (N, NODE_F), jnp.float32)
    edge_feats = jax.random.normal(k_ef, (E, EDGE_F), jnp.float32)
    # keep edges within their own graph (nodes 0..5 -> graph 0, 6..11 -> graph 1)
    esrc_idx = jax.random.randint(k_src, (E,), 0, N // 2)
    etgt_idx = jax.random.randint(k_tgt, (E,), 0, N // 2)
    half = E // 2
    esrc_idx = esrc_idx.at[half:].add(N // 2)
    etgt_idx = etgt_idx.at[half:].add(N // 2)
    batch_idx = jnp.concatenate(
        [jnp.zeros((N // 2,), jnp.int32), jnp.ones((N // 2,), jnp.int32)])

    params = init_params(k_par, NODE_F, EDGE_F, HIDDEN, TARGET_F, NUM_LAYERS)

    out = mpnn_forward(node_feats, edge_feats, esrc_idx, etgt_idx,
                       batch_idx, params, NUM_GRAPHS)
    out = jax.block_until_ready(out)

    ref = mpnn_reference(node_feats, edge_feats, esrc_idx, etgt_idx,
                         batch_idx, params, NUM_GRAPHS)
    np.testing.assert_allclose(np.asarray(out), np.asarray(ref),
                               rtol=1e-4, atol=1e-4)
    print("KERNEL_OK")
</pallas_src>

<mosaic_0001>
module attributes {stable_mosaic.version = 11 : i64} {
  func.func @mpnn_kernel(%arg0: i32, %arg1: memref<24x1xi32, #tpu.memory_space<vmem>>, %arg2: memref<24x1xi32, #tpu.memory_space<vmem>>, %arg3: memref<16x1xi32, #tpu.memory_space<vmem>>, %arg4: memref<16x128xf32, #tpu.memory_space<vmem>>, %arg5: memref<24x128xf32, #tpu.memory_space<vmem>>, %arg6: memref<128x128xf32, #tpu.memory_space<vmem>>, %arg7: memref<1x128xf32, #tpu.memory_space<vmem>>, %arg8: memref<128x128xf32, #tpu.memory_space<vmem>>, %arg9: memref<1x128xf32, #tpu.memory_space<vmem>>, %arg10: memref<3x128x128xf32, #tpu.memory_space<vmem>>, %arg11: memref<3x1x128xf32, #tpu.memory_space<vmem>>, %arg12: memref<128x128xf32, #tpu.memory_space<vmem>>, %arg13: memref<1x128xf32, #tpu.memory_space<vmem>>, %arg14: memref<8x128xf32, #tpu.memory_space<vmem>>, %arg15: memref<16x128xf32, #tpu.memory_space<vmem>>) attributes {dimension_semantics = [#tpu.dimension_semantics<arbitrary>], iteration_bounds = array<i64: 1>, scalar_prefetch = 0 : i64, scratch_operands = 1 : i64, tpu.core_type = #tpu.core_type<tc>, window_params = [{pipeline_mode = #tpu.pipeline_mode<synchronous>, transform_indices = @transform_0, window_bounds = array<i64: 24, 1>}, {pipeline_mode = #tpu.pipeline_mode<synchronous>, transform_indices = @transform_1, window_bounds = array<i64: 24, 1>}, {pipeline_mode = #tpu.pipeline_mode<synchronous>, transform_indices = @transform_2, window_bounds = array<i64: 16, 1>}, {pipeline_mode = #tpu.pipeline_mode<synchronous>, transform_indices = @transform_3, window_bounds = array<i64: 16, 128>}, {pipeline_mode = #tpu.pipeline_mode<synchronous>, transform_indices = @transform_4, window_bounds = array<i64: 24, 128>}, {pipeline_mode = #tpu.pipeline_mode<synchronous>, transform_indices = @transform_5, window_bounds = array<i64: 128, 128>}, {pipeline_mode = #tpu.pipeline_mode<synchronous>, transform_indices = @transform_6, window_bounds = array<i64: 1, 128>}, {pipeline_mode = #tpu.pipeline_mode<synchronous>, transform_indices = @transform_7, window_bounds = array<i64: 128, 128>}, {pipeline_mode = #tpu.pipeline_mode<synchronous>, transform_indices = @transform_8, window_bounds = array<i64: 1, 128>}, {pipeline_mode = #tpu.pipeline_mode<synchronous>, transform_indices = @transform_9, window_bounds = array<i64: 3, 128, 128>}, {pipeline_mode = #tpu.pipeline_mode<synchronous>, transform_indices = @transform_10, window_bounds = array<i64: 3, 1, 128>}, {pipeline_mode = #tpu.pipeline_mode<synchronous>, transform_indices = @transform_11, window_bounds = array<i64: 128, 128>}, {pipeline_mode = #tpu.pipeline_mode<synchronous>, transform_indices = @transform_12, window_bounds = array<i64: 1, 128>}, {pipeline_mode = #tpu.pipeline_mode<synchronous>, transform_indices = @transform_13, window_bounds = array<i64: 8, 128>}]} {
    %0 = tpu.iota {dimensions = array<i32: 1>} : vector<24x16xi32>
    %c0 = arith.constant 0 : index
    %c0_0 = arith.constant 0 : index
    %1 = vector.load %arg1[%c0, %c0_0] : memref<24x1xi32, #tpu.memory_space<vmem>>, vector<24x1xi32>
    %2 = vector.broadcast %1 : vector<24x1xi32> to vector<24x16xi32>
    %3 = arith.cmpi eq, %2, %0 : vector<24x16xi32>
    %4 = arith.extui %3 : vector<24x16xi1> to vector<24x16xi32>
    %5 = arith.sitofp %4 : vector<24x16xi32> to vector<24x16xf32>
    %c0_1 = arith.constant 0 : index
    %c0_2 = arith.constant 0 : index
    %6 = vector.load %arg2[%c0_1, %c0_2] : memref<24x1xi32, #tpu.memory_space<vmem>>, vector<24x1xi32>
    %7 = vector.broadcast %6 : vector<24x1xi32> to vector<24x16xi32>
    %8 = arith.cmpi eq, %7, %0 : vector<24x16xi32>
    %9 = arith.extui %8 : vector<24x16xi1> to vector<24x16xi32>
    %10 = arith.sitofp %9 : vector<24x16xi32> to vector<24x16xf32>
    %11 = tpu.iota {dimensions = array<i32: 1>} : vector<16x8xi32>
    %c0_3 = arith.constant 0 : index
    %c0_4 = arith.constant 0 : index
    %12 = vector.load %arg3[%c0_3, %c0_4] : memref<16x1xi32, #tpu.memory_space<vmem>>, vector<16x1xi32>
    %13 = vector.broadcast %12 : vector<16x1xi32> to vector<16x8xi32>
    %14 = arith.cmpi eq, %13, %11 : vector<16x8xi32>
    %15 = arith.extui %14 : vector<16x8xi1> to vector<16x8xi32>
    %16 = arith.sitofp %15 : vector<16x8xi32> to vector<16x8xf32>
    %c0_5 = arith.constant 0 : index
    %c0_6 = arith.constant 0 : index
    %17 = vector.load %arg5[%c0_5, %c0_6] : memref<24x128xf32, #tpu.memory_space<vmem>>, vector<24x128xf32>
    %c0_7 = arith.constant 0 : index
    %c0_8 = arith.constant 0 : index
    %18 = vector.load %arg6[%c0_7, %c0_8] : memref<128x128xf32, #tpu.memory_space<vmem>>, vector<128x128xf32>
    %cst = arith.constant dense<0.000000e+00> : vector<24x128xf32>
    %19 = tpu.matmul %17, %18, %cst {dimension_numbers = #tpu.dot_dimension_numbers<[1], [0], [0], [1], [0, 0, 1, 1], [], []>} : vector<24x128xf32>, vector<128x128xf32>, vector<24x128xf32> -> vector<24x128xf32>
    %c0_9 = arith.constant 0 : index
    %c0_10 = arith.constant 0 : index
    %20 = vector.load %arg7[%c0_9, %c0_10] : memref<1x128xf32, #tpu.memory_space<vmem>>, vector<1x128xf32>
    %21 = vector.broadcast %20 : vector<1x128xf32> to vector<24x128xf32>
    %22 = arith.addf %19, %21 : vector<24x128xf32>
    %cst_11 = arith.constant 0.000000e+00 : f32
    %23 = vector.broadcast %cst_11 : f32 to vector<24x128xf32>
    %24 = arith.maximumf %22, %23 : vector<24x128xf32>
    %c0_12 = arith.constant 0 : index
    %c0_13 = arith.constant 0 : index
    %25 = vector.load %arg4[%c0_12, %c0_13] : memref<16x128xf32, #tpu.memory_space<vmem>>, vector<16x128xf32>
    %c0_14 = arith.constant 0 : index
    %c0_15 = arith.constant 0 : index
    %26 = vector.load %arg8[%c0_14, %c0_15] : memref<128x128xf32, #tpu.memory_space<vmem>>, vector<128x128xf32>
    %cst_16 = arith.constant dense<0.000000e+00> : vector<16x128xf32>
    %27 = tpu.matmul %25, %26, %cst_16 {dimension_numbers = #tpu.dot_dimension_numbers<[1], [0], [0], [1], [0, 0, 1, 1], [], []>} : vector<16x128xf32>, vector<128x128xf32>, vector<16x128xf32> -> vector<16x128xf32>
    %c0_17 = arith.constant 0 : index
    %c0_18 = arith.constant 0 : index
    %28 = vector.load %arg9[%c0_17, %c0_18] : memref<1x128xf32, #tpu.memory_space<vmem>>, vector<1x128xf32>
    %29 = vector.broadcast %28 : vector<1x128xf32> to vector<16x128xf32>
    %30 = arith.addf %27, %29 : vector<16x128xf32>
    %c0_19 = arith.constant 0 : index
    %c0_20 = arith.constant 0 : index
    %31 = vector.load %arg15[%c0_19, %c0_20] : memref<16x128xf32, #tpu.memory_space<vmem>>, vector<16x128xf32>
    tpu.vector_store %arg15[%c0_19, %c0_20], %30 {strides = array<i32>} : memref<16x128xf32, #tpu.memory_space<vmem>>, vector<16x128xf32>,
    %c0_21 = arith.constant 0 : index
    %c0_22 = arith.constant 0 : index
    %32 = vector.load %arg15[%c0_21, %c0_22] : memref<16x128xf32, #tpu.memory_space<vmem>>, vector<16x128xf32>
    %c0_23 = arith.constant 0 : index
    %c0_24 = arith.constant 0 : index
    %c0_25 = arith.constant 0 : index
    %33 = vector.load %arg10[%c0_23, %c0_24, %c0_25] : memref<3x128x128xf32, #tpu.memory_space<vmem>>, vector<1x128x128xf32>
    %34 = vector.shape_cast %33 : vector<1x128x128xf32> to vector<128x128xf32>
    %cst_26 = arith.constant dense<0.000000e+00> : vector<16x128xf32>
    %35 = tpu.matmul %32, %34, %cst_26 {dimension_numbers = #tpu.dot_dimension_numbers<[1], [0], [0], [1], [0, 0, 1, 1], [], []>} : vector<16x128xf32>, vector<128x128xf32>, vector<16x128xf32> -> vector<16x128xf32>
    %c0_27 = arith.constant 0 : index
    %c0_28 = arith.constant 0 : index
    %c0_29 = arith.constant 0 : index
    %36 = vector.load %arg11[%c0_27, %c0_28, %c0_29] : memref<3x1x128xf32, #tpu.memory_space<vmem>>, vector<1x1x128xf32>
    %37 = vector.shape_cast %36 : vector<1x1x128xf32> to vector<1x128xf32>
    %38 = vector.broadcast %37 : vector<1x128xf32> to vector<16x128xf32>
    %39 = arith.addf %35, %38 : vector<16x128xf32>
    %cst_30 = arith.constant dense<0.000000e+00> : vector<24x128xf32>
    %40 = tpu.matmul %5, %39, %cst_30 {dimension_numbers = #tpu.dot_dimension_numbers<[1], [0], [0], [1], [0, 0, 1, 1], [], []>} : vector<24x16xf32>, vector<16x128xf32>, vector<24x128xf32> -> vector<24x128xf32>
    %41 = arith.mulf %24, %40 : vector<24x128xf32>
    %cst_31 = arith.constant dense<0.000000e+00> : vector<16x128xf32>
    %42 = tpu.matmul %10, %41, %cst_31 {dimension_numbers = #tpu.dot_dimension_numbers<[0], [0], [1], [1], [0, 1, 1, 1], [], []>} : vector<24x16xf32>, vector<24x128xf32>, vector<16x128xf32> -> vector<16x128xf32>
    %cst_32 = arith.constant 0.000000e+00 : f32
    %43 = vector.broadcast %cst_32 : f32 to vector<16x128xf32>
    %44 = arith.maximumf %42, %43 : vector<16x128xf32>
    %c0_33 = arith.constant 0 : index
    %c0_34 = arith.constant 0 : index
    %45 = vector.load %arg15[%c0_33, %c0_34] : memref<16x128xf32, #tpu.memory_space<vmem>>, vector<16x128xf32>
    tpu.vector_store %arg15[%c0_33, %c0_34], %44 {strides = array<i32>} : memref<16x128xf32, #tpu.memory_space<vmem>>, vector<16x128xf32>,
    %c0_35 = arith.constant 0 : index
    %c0_36 = arith.constant 0 : index
    %46 = vector.load %arg15[%c0_35, %c0_36] : memref<16x128xf32, #tpu.memory_space<vmem>>, vector<16x128xf32>
    %c1 = arith.constant 1 : index
    %c0_37 = arith.constant 0 : index
    %c0_38 = arith.constant 0 : index
    %47 = vector.load %arg10[%c1, %c0_37, %c0_38] : memref<3x128x128xf32, #tpu.memory_space<vmem>>, vector<1x128x128xf32>
    %48 = vector.shape_cast %47 : vector<1x128x128xf32> to vector<128x128xf32>
    %cst_39 = arith.constant dense<0.000000e+00> : vector<16x128xf32>
    %49 = tpu.matmul %46, %48, %cst_39 {dimension_numbers = #tpu.dot_dimension_numbers<[1], [0], [0], [1], [0, 0, 1, 1], [], []>} : vector<16x128xf32>, vector<128x128xf32>, vector<16x128xf32> -> vector<16x128xf32>
    %c1_40 = arith.constant 1 : index
    %c0_41 = arith.constant 0 : index
    %c0_42 = arith.constant 0 : index
    %50 = vector.load %arg11[%c1_40, %c0_41, %c0_42] : memref<3x1x128xf32, #tpu.memory_space<vmem>>, vector<1x1x128xf32>
    %51 = vector.shape_cast %50 : vector<1x1x128xf32> to vector<1x128xf32>
    %52 = vector.broadcast %51 : vector<1x128xf32> to vector<16x128xf32>
    %53 = arith.addf %49, %52 : vector<16x128xf32>
    %cst_43 = arith.constant dense<0.000000e+00> : vector<24x128xf32>
    %54 = tpu.matmul %5, %53, %cst_43 {dimension_numbers = #tpu.dot_dimension_numbers<[1], [0], [0], [1], [0, 0, 1, 1], [], []>} : vector<24x16xf32>, vector<16x128xf32>, vector<24x128xf32> -> vector<24x128xf32>
    %55 = arith.mulf %24, %54 : vector<24x128xf32>
    %cst_44 = arith.constant dense<0.000000e+00> : vector<16x128xf32>
    %56 = tpu.matmul %10, %55, %cst_44 {dimension_numbers = #tpu.dot_dimension_numbers<[0], [0], [1], [1], [0, 1, 1, 1], [], []>} : vector<24x16xf32>, vector<24x128xf32>, vector<16x128xf32> -> vector<16x128xf32>
    %cst_45 = arith.constant 0.000000e+00 : f32
    %57 = vector.broadcast %cst_45 : f32 to vector<16x128xf32>
    %58 = arith.maximumf %56, %57 : vector<16x128xf32>
    %c0_46 = arith.constant 0 : index
    %c0_47 = arith.constant 0 : index
    %59 = vector.load %arg15[%c0_46, %c0_47] : memref<16x128xf32, #tpu.memory_space<vmem>>, vector<16x128xf32>
    tpu.vector_store %arg15[%c0_46, %c0_47], %58 {strides = array<i32>} : memref<16x128xf32, #tpu.memory_space<vmem>>, vector<16x128xf32>,
    %c0_48 = arith.constant 0 : index
    %c0_49 = arith.constant 0 : index
    %60 = vector.load %arg15[%c0_48, %c0_49] : memref<16x128xf32, #tpu.memory_space<vmem>>, vector<16x128xf32>
    %c2 = arith.constant 2 : index
    %c0_50 = arith.constant 0 : index
    %c0_51 = arith.constant 0 : index
    %61 = vector.load %arg10[%c2, %c0_50, %c0_51] : memref<3x128x128xf32, #tpu.memory_space<vmem>>, vector<1x128x128xf32>
    %62 = vector.shape_cast %61 : vector<1x128x128xf32> to vector<128x128xf32>
    %cst_52 = arith.constant dense<0.000000e+00> : vector<16x128xf32>
    %63 = tpu.matmul %60, %62, %cst_52 {dimension_numbers = #tpu.dot_dimension_numbers<[1], [0], [0], [1], [0, 0, 1, 1], [], []>} : vector<16x128xf32>, vector<128x128xf32>, vector<16x128xf32> -> vector<16x128xf32>
    %c2_53 = arith.constant 2 : index
    %c0_54 = arith.constant 0 : index
    %c0_55 = arith.constant 0 : index
    %64 = vector.load %arg11[%c2_53, %c0_54, %c0_55] : memref<3x1x128xf32, #tpu.memory_space<vmem>>, vector<1x1x128xf32>
    %65 = vector.shape_cast %64 : vector<1x1x128xf32> to vector<1x128xf32>
    %66 = vector.broadcast %65 : vector<1x128xf32> to vector<16x128xf32>
    %67 = arith.addf %63, %66 : vector<16x128xf32>
    %cst_56 = arith.constant dense<0.000000e+00> : vector<24x128xf32>
    %68 = tpu.matmul %5, %67, %cst_56 {dimension_numbers = #tpu.dot_dimension_numbers<[1], [0], [0], [1], [0, 0, 1, 1], [], []>} : vector<24x16xf32>, vector<16x128xf32>, vector<24x128xf32> -> vector<24x128xf32>
    %69 = arith.mulf %24, %68 : vector<24x128xf32>
    %cst_57 = arith.constant dense<0.000000e+00> : vector<16x128xf32>
    %70 = tpu.matmul %10, %69, %cst_57 {dimension_numbers = #tpu.dot_dimension_numbers<[0], [0], [1], [1], [0, 1, 1, 1], [], []>} : vector<24x16xf32>, vector<24x128xf32>, vector<16x128xf32> -> vector<16x128xf32>
    %c0_58 = arith.constant 0 : index
    %c0_59 = arith.constant 0 : index
    %71 = vector.load %arg15[%c0_58, %c0_59] : memref<16x128xf32, #tpu.memory_space<vmem>>, vector<16x128xf32>
    tpu.vector_store %arg15[%c0_58, %c0_59], %70 {strides = array<i32>} : memref<16x128xf32, #tpu.memory_space<vmem>>, vector<16x128xf32>,
    %c0_60 = arith.constant 0 : index
    %c0_61 = arith.constant 0 : index
    %72 = vector.load %arg15[%c0_60, %c0_61] : memref<16x128xf32, #tpu.memory_space<vmem>>, vector<16x128xf32>
    %c0_62 = arith.constant 0 : index
    %c0_63 = arith.constant 0 : index
    %73 = vector.load %arg12[%c0_62, %c0_63] : memref<128x128xf32, #tpu.memory_space<vmem>>, vector<128x128xf32>
    %cst_64 = arith.constant dense<0.000000e+00> : vector<16x128xf32>
    %74 = tpu.matmul %72, %73, %cst_64 {dimension_numbers = #tpu.dot_dimension_numbers<[1], [0], [0], [1], [0, 0, 1, 1], [], []>} : vector<16x128xf32>, vector<128x128xf32>, vector<16x128xf32> -> vector<16x128xf32>
    %c0_65 = arith.constant 0 : index
    %c0_66 = arith.constant 0 : index
    %75 = vector.load %arg13[%c0_65, %c0_66] : memref<1x128xf32, #tpu.memory_space<vmem>>, vector<1x128xf32>
    %76 = vector.broadcast %75 : vector<1x128xf32> to vector<16x128xf32>
    %77 = arith.addf %74, %76 : vector<16x128xf32>
    %cst_67 = arith.constant dense<0.000000e+00> : vector<8x128xf32>
    %78 = tpu.matmul %16, %77, %cst_67 {dimension_numbers = #tpu.dot_dimension_numbers<[0], [0], [1], [1], [0, 1, 1, 1], [], []>} : vector<16x8xf32>, vector<16x128xf32>, vector<8x128xf32> -> vector<8x128xf32>
    %c0_68 = arith.constant 0 : index
    %c0_69 = arith.constant 0 : index
    %79 = vector.load %arg14[%c0_68, %c0_69] : memref<8x128xf32, #tpu.memory_space<vmem>>, vector<8x128xf32>
    tpu.vector_store %arg14[%c0_68, %c0_69], %78 {strides = array<i32>} : memref<8x128xf32, #tpu.memory_space<vmem>>, vector<8x128xf32>,
    return
  }
  func.func @transform_0(%arg0: i32) -> (i32, i32) {
    %c0_i32 = arith.constant 0 : i32
    %c0_i32_0 = arith.constant 0 : i32
    %c0_i32_1 = arith.constant 0 : i32
    return %c0_i32, %c0_i32_0 : i32, i32
  }
  func.func @transform_1(%arg0: i32) -> (i32, i32) {
    %c0_i32 = arith.constant 0 : i32
    %c0_i32_0 = arith.constant 0 : i32
    %c0_i32_1 = arith.constant 0 : i32
    return %c0_i32, %c0_i32_0 : i32, i32
  }
  func.func @transform_2(%arg0: i32) -> (i32, i32) {
    %c0_i32 = arith.constant 0 : i32
    %c0_i32_0 = arith.constant 0 : i32
    %c0_i32_1 = arith.constant 0 : i32
    return %c0_i32, %c0_i32_0 : i32, i32
  }
  func.func @transform_3(%arg0: i32) -> (i32, i32) {
    %c0_i32 = arith.constant 0 : i32
    %c0_i32_0 = arith.constant 0 : i32
    %c0_i32_1 = arith.constant 0 : i32
    return %c0_i32, %c0_i32_0 : i32, i32
  }
  func.func @transform_4(%arg0: i32) -> (i32, i32) {
    %c0_i32 = arith.constant 0 : i32
    %c0_i32_0 = arith.constant 0 : i32
    %c0_i32_1 = arith.constant 0 : i32
    return %c0_i32, %c0_i32_0 : i32, i32
  }
  func.func @transform_5(%arg0: i32) -> (i32, i32) {
    %c0_i32 = arith.constant 0 : i32
    %c0_i32_0 = arith.constant 0 : i32
    %c0_i32_1 = arith.constant 0 : i32
    return %c0_i32, %c0_i32_0 : i32, i32
  }
  func.func @transform_6(%arg0: i32) -> (i32, i32) {
    %c0_i32 = arith.constant 0 : i32
    %c0_i32_0 = arith.constant 0 : i32
    %c0_i32_1 = arith.constant 0 : i32
    return %c0_i32, %c0_i32_0 : i32, i32
  }
  func.func @transform_7(%arg0: i32) -> (i32, i32) {
    %c0_i32 = arith.constant 0 : i32
    %c0_i32_0 = arith.constant 0 : i32
    %c0_i32_1 = arith.constant 0 : i32
    return %c0_i32, %c0_i32_0 : i32, i32
  }
  func.func @transform_8(%arg0: i32) -> (i32, i32) {
    %c0_i32 = arith.constant 0 : i32
    %c0_i32_0 = arith.constant 0 : i32
    %c0_i32_1 = arith.constant 0 : i32
    return %c0_i32, %c0_i32_0 : i32, i32
  }
  func.func @transform_9(%arg0: i32) -> (i32, i32, i32) {
    %c0_i32 = arith.constant 0 : i32
    %c0_i32_0 = arith.constant 0 : i32
    %c0_i32_1 = arith.constant 0 : i32
    %c0_i32_2 = arith.constant 0 : i32
    return %c0_i32, %c0_i32_0, %c0_i32_1 : i32, i32, i32
  }
  func.func @transform_10(%arg0: i32) -> (i32, i32, i32) {
    %c0_i32 = arith.constant 0 : i32
    %c0_i32_0 = arith.constant 0 : i32
    %c0_i32_1 = arith.constant 0 : i32
    %c0_i32_2 = arith.constant 0 : i32
    return %c0_i32, %c0_i32_0, %c0_i32_1 : i32, i32, i32
  }
  func.func @transform_11(%arg0: i32) -> (i32, i32) {
    %c0_i32 = arith.constant 0 : i32
    %c0_i32_0 = arith.constant 0 : i32
    %c0_i32_1 = arith.constant 0 : i32
    return %c0_i32, %c0_i32_0 : i32, i32
  }
  func.func @transform_12(%arg0: i32) -> (i32, i32) {
    %c0_i32 = arith.constant 0 : i32
    %c0_i32_0 = arith.constant 0 : i32
    %c0_i32_1 = arith.constant 0 : i32
    return %c0_i32, %c0_i32_0 : i32, i32
  }
  func.func @transform_13(%arg0: i32) -> (i32, i32) {
    %c0_i32 = arith.constant 0 : i32
    %c0_i32_0 = arith.constant 0 : i32
    %c0_i32_1 = arith.constant 0 : i32
    return %c0_i32, %c0_i32_0 : i32, i32
  }
}

</mosaic_0001>

<bundles_post_ra>
// kernel: tpu_custom_call.1
= control target key start
LH: loop header
LB: loop body
LE: loop exit
PB: predicated region body
PF: predicated region fallthrough
CT: control target
= control target key end

     0   :  { %18 = vsyncpa [#allocation4], 0  ;;  %s2569_s0 = inlined_call_operand.vmem [shape: s32[24,1], index: 0, kind: input, shape index: {}]   ;;  %s2570_s1 = inlined_call_operand.vmem [shape: s32[24,1], index: 1, kind: input, shape index: {}]   ;;  %s2571_s2 = inlined_call_operand.vmem [shape: s32[16,1], index: 2, kind: input, shape index: {}]   ;;  %s2572_s3 = inlined_call_operand.vmem [shape: f32[16,128], index: 3, kind: input, shape index: {}]   ;;  %s2573_s4 = inlined_call_operand.vmem [shape: f32[24,128], index: 4, kind: input, shape index: {}]   ;;  %s2574_s5 = inlined_call_operand.hbm [shape: f32[128,128], index: 5, kind: input, shape index: {}]   ;;  %s2575_s6 = inlined_call_operand.vmem [shape: f32[1,128], index: 6, kind: input, shape index: {}]   ;;  %s2576_s7 = inlined_call_operand.hbm [shape: f32[128,128], index: 7, kind: input, shape index: {}]   ;;  %s2577_s8 = inlined_call_operand.vmem [shape: f32[1,128], index: 8, kind: input, shape index: {}]   ;;  %s2578_s9 = inlined_call_operand.hbm [shape: f32[3,128,128], index: 9, kind: input, shape index: {}]   ;;  %s2579_s10 = inlined_call_operand.vmem [shape: f32[3,1,128], index: 10, kind: input, shape index: {}]   ;;  %s2580_s11 = inlined_call_operand.hbm [shape: f32[128,128], index: 11, kind: input, shape index: {}]   ;;  %s2581_s12 = inlined_call_operand.vmem [shape: f32[1,128], index: 12, kind: input, shape index: {}]   ;;  %s2582_s13 = inlined_call_operand.hbm [shape: f32[8,128], index: 13, kind: output, shape index: {}]  }
   0x1   :  { %19 = vsyncpa [#allocation7], 0 }
   0x2   :  { %20 = vsyncpa [#allocation10], 0 }
   0x3   :  { %21 = vsyncpa [#allocation5], 0  ;;  %s2233_s25 = smov [#allocation6]   ;;  %s2234_s27 = smov [#allocation3]  }
   0x4   :  { %s51_s26 = sshll.u32 %s2233_s25, 4  ;;  %s37_s28 = sshll.u32 %s2234_s27, 4  ;;  %s52_s26 = int_to_ptr.vmem [resolvable:$true] %s51_s26  ;;  %s2314_s28 = int_to_ptr.vmem [resolvable:$true] %s37_s28 }
   0x5   :  { %s2115_s14 = scalar_lea.hbm %s2576_s7, 2048 }
   0x6   :  { %p2116_p0 = scmp.ne.s32.totalorder %s2576_s7, %s2115_s14  ;;  %p2119_p1 = scmp.lt.u32.totalorder %s2115_s14, %s2576_s7 }
   0x8   :  { %p2121_p2 = pnand %p2119_p1, %p2116_p0 }
   0xa   :  { %2124 = shalt.err (!%p2121_p2)
}
   0xb   :  { %s2125_s19 = scalar_lea.vmem %s52_s26, 2048  ;;  %p2130_p4 = scmp.lt.s32.totalorder %s52_s26, %s52_s26 }
   0xc   :  { %p2126_p3 = scmp.ne.s32.totalorder %s52_s26, %s2125_s19  ;;  %p2131_p5 = scmp.lt.s32.totalorder %s2125_s19, %s2125_s19 }
   0xe   :  { %p2132_p6 = por %p2131_p5, %p2130_p4 }
  0x10   :  { %p2133_p7 = pnand %p2132_p6, %p2126_p3 }
  0x12   :  { %2136 = shalt.err (!%p2133_p7)
}
  0x13   :  { %s2235_s20 = smov 128   ;;  %s2236_s21 = smov 8  }
  0x14   :  { %57 = dma.hbm_to_vmem [thread:$0]  %s2576_s7, 2048, %s52_s26, [#allocation7], %s2235_s20, %s2235_s20, %s2236_s21  }
  0x15   :  { %s2137_s27 = scalar_lea.hbm %s2574_s5, 2048 }
  0x16   :  { %p2138_p8 = scmp.ne.s32.totalorder %s2574_s5, %s2137_s27  ;;  %p2141_p9 = scmp.lt.u32.totalorder %s2137_s27, %s2574_s5 }
  0x18   :  { %p2143_p10 = pnand %p2141_p9, %p2138_p8 }
  0x1a   :  { %2146 = shalt.err (!%p2143_p10)
}
  0x1b   :  { %s2147_s16 = scalar_lea.vmem %s2314_s28, 2048  ;;  %p2152_p12 = scmp.lt.s32.totalorder %s2314_s28, %s2314_s28 }
  0x1c   :  { %p2148_p11 = scmp.ne.s32.totalorder %s2314_s28, %s2147_s16  ;;  %p2153_p13 = scmp.lt.s32.totalorder %s2147_s16, %s2147_s16 }
  0x1e   :  { %p2154_p0 = por %p2153_p13, %p2152_p12 }
  0x20   :  { %p2155_p1 = pnand %p2154_p0, %p2148_p11 }
  0x22   :  { %2158 = shalt.err (!%p2155_p1)
}
  0x23   :  { %43 = dma.hbm_to_vmem [thread:$0]  %s2574_s5, 2048, %s2314_s28, [#allocation4], %s2235_s20, %s2235_s20, %s2236_s21  }
  0x24   :  { %s2237_s17 = smov [#allocation8]   ;;  %s2238_s19 = smov [#allocation9]  }
  0x25   :  { %s65_s18 = sshll.u32 %s2237_s17, 4  ;;  %s79_s22 = sshll.u32 %s2238_s19, 4  ;;  %s66_s18 = int_to_ptr.vmem [resolvable:$true] %s65_s18  ;;  %s2351_s22 = int_to_ptr.vmem [resolvable:$true] %s79_s22 }
  0x26   :  { %s2159_s25 = scalar_lea.hbm %s2578_s9, 6144 }
  0x27   :  { %p2160_p2 = scmp.ne.s32.totalorder %s2578_s9, %s2159_s25  ;;  %p2163_p3 = scmp.lt.u32.totalorder %s2159_s25, %s2578_s9 }
  0x29   :  { %p2165_p4 = pnand %p2163_p3, %p2160_p2 }
  0x2b   :  { %2168 = shalt.err (!%p2165_p4)
}
  0x2c   :  { %s2169_s5 = scalar_lea.vmem %s66_s18, 6144  ;;  %p2174_p6 = scmp.lt.s32.totalorder %s66_s18, %s66_s18 }
  0x2d   :  { %p2170_p5 = scmp.ne.s32.totalorder %s66_s18, %s2169_s5  ;;  %p2175_p7 = scmp.lt.s32.totalorder %s2169_s5, %s2169_s5 }
  0x2f   :  { %p2176_p8 = por %p2175_p7, %p2174_p6 }
  0x31   :  { %p2177_p9 = pnand %p2176_p8, %p2170_p5 }
  0x33   :  { %2180 = shalt.err (!%p2177_p9)
}
  0x34   :  { %71 = dma.hbm_to_vmem [thread:$0]  %s2578_s9, 6144, %s66_s18, [#allocation7], %s2235_s20, %s2235_s20, %s2236_s21  }
  0x35   :  { %s2181_s26 = scalar_lea.hbm %s2580_s11, 2048 }
  0x36   :  { %p2182_p10 = scmp.ne.s32.totalorder %s2580_s11, %s2181_s26  ;;  %p2185_p11 = scmp.lt.u32.totalorder %s2181_s26, %s2580_s11 }
  0x38   :  { %p2187_p12 = pnand %p2185_p11, %p2182_p10 }
  0x3a   :  { %2190 = shalt.err (!%p2187_p12)
}
  0x3b   :  { %s2191_s25 = scalar_lea.vmem %s2351_s22, 2048  ;;  %p2196_p0 = scmp.lt.s32.totalorder %s2351_s22, %s2351_s22 }
  0x3c   :  { %p2192_p13 = scmp.ne.s32.totalorder %s2351_s22, %s2191_s25  ;;  %p2197_p1 = scmp.lt.s32.totalorder %s2191_s25, %s2191_s25 }
  0x3e   :  { %p2198_p2 = por %p2197_p1, %p2196_p0 }
  0x40   :  { %p2199_p3 = pnand %p2198_p2, %p2192_p13 }
  0x42   :  { %2202 = shalt.err (!%p2199_p3)
}
  0x43   :  { %85 = dma.hbm_to_vmem [thread:$0]  %s2580_s11, 2048, %s2351_s22, [#allocation10], %s2235_s20, %s2235_s20, %s2236_s21  }
  0x44   :  { %2225 = dma.done.wait [#allocation4], 2048  }
  0x45   :  { %2226 = vsyncadd [#allocation4], 4294965248 }
  0x46   :  { %2227 = dma.done.wait [#allocation7], 8192  }
  0x47   :  { %2228 = vsyncadd [#allocation7], 4294959104 }
  0x48   :  { %2229 = dma.done.wait [#allocation10], 2048  }
  0x49   :  { %2230 = vsyncadd [#allocation10], 4294965248  ;;  %v2239_v0 = vmov 0.0|0.0   ;;  %vm2240_vm0 = vmmov 0   ;;  %v2241_v1 = vmov 0.0   ;;  %v269_v2 = vld [vmem:[#allocation6] sm:$0xff] }
  0x4a   :  { %1892 = vmatprep.subr.bf16.mxu0 %v2239_v0  ;;  %1635 = vmatprep.mubr.msk.f32.mxu0 %vm2240_vm0, %v2241_v1  ;;  %v270_v3 = vld [vmem:[#allocation6 + $0x8] sm:$0xff]  ;;  %v271_v4 = vld [vmem:[#allocation6 + $0x10] sm:$0xff]  ;;  %v272_v6 = vld [vmem:[#allocation6 + $0x18] sm:$0xff]  ;;  %vm469_vm7 = vcmask 130048   ;;  %vm594_vm10 = vcmask 195584   ;;  %s2243_s5 = smov [#allocation11]  }
  0x4b   :  { %v1916_v5 = vpack.c.bf16 %v270_v3, %v269_v2  ;;  %v1920_v7 = vpack.c.bf16 %v272_v6, %v271_v4  ;;  %v273_v8 = vld [vmem:[#allocation6 + $0x20] sm:$0xff]  ;;  %v274_v9 = vld [vmem:[#allocation6 + $0x28] sm:$0xff]  ;;  %v275_v11 = vld [vmem:[#allocation6 + $0x30] sm:$0xff] }
  0x4c   :  { %v1924_v10 = vpack.c.bf16 %v274_v9, %v273_v8  ;;  %v276_v12 = vld [vmem:[#allocation6 + $0x38] sm:$0xff]  ;;  %v267_v13 = vld [vmem:[%s2572_s3] sm:$0xff]  ;;  %v162_v15 = vld [vmem:[#allocation3 + $0x8] sm:$0xff] }
  0x4d   :  { %1917 = vmatprep.subr.bf16.mxu1 %v1916_v5  ;;  %1676 = vmatprep.mubr.f32.mxu1 %v267_v13  ;;  %v161_v14 = vld [vmem:[#allocation3] sm:$0xff]  ;;  %v163_v16 = vld [vmem:[#allocation3 + $0x10] sm:$0xff]  ;;  %v164_v18 = vld [vmem:[#allocation3 + $0x18] sm:$0xff]  ;;  %v1928_v19 = vpack.c.bf16 %v276_v12, %v275_v11 }
  0x4e   :  { %1919 = vmatpush3.bf16.msra.mxu1 %v1916_v5  ;;  %v1893_v17 = vpack.c.bf16 %v162_v15, %v161_v14  ;;  %v277_v20 = vld [vmem:[#allocation6 + $0x40] sm:$0xff]  ;;  %v1896_v21 = vpack.c.bf16 %v164_v18, %v163_v16  ;;  %v278_v22 = vld [vmem:[#allocation6 + $0x48] sm:$0xff]  ;;  %v279_v26 = vld [vmem:[#allocation6 + $0x50] sm:$0xff] }
  0x4f   :  { %1921 = vmatprep.subr.bf16.mxu1 %v1920_v7  ;;  %v165_v23 = vld [vmem:[#allocation3 + $0x20] sm:$0xff]  ;;  %v166_v24 = vld [vmem:[#allocation3 + $0x28] sm:$0xff]  ;;  %v1932_v25 = vpack.c.bf16 %v278_v22, %v277_v20  ;;  %v280_v28 = vld [vmem:[#allocation6 + $0x58] sm:$0xff] }
  0x50   :  { %1894 = vmatpush3.bf16.msra.mxu0 %v1893_v17  ;;  %v1899_v27 = vpack.c.bf16 %v166_v24, %v165_v23  ;;  %v167_v29 = vld [vmem:[#allocation3 + $0x30] sm:$0xff]  ;;  %v168_v30 = vld [vmem:[#allocation3 + $0x38] sm:$0xff]  ;;  %v1936_v31 = vpack.c.bf16 %v280_v28, %v279_v26  ;;  %v281_v32 = vld [vmem:[#allocation6 + $0x60] sm:$0xff] }
  0x51   :  { %1895 = vmatprep.subr.bf16.mxu0 %v2239_v0  ;;  %v1902_v33 = vpack.c.bf16 %v168_v30, %v167_v29  ;;  %v282_v34 = vld [vmem:[#allocation6 + $0x68] sm:$0xff]  ;;  %v169_v35 = vld [vmem:[#allocation3 + $0x40] sm:$0xff]  ;;  %v283_v38 = vld [vmem:[#allocation6 + $0x70] sm:$0xff] }
  0x52   :  { %1923 = vmatpush3.bf16.msra.mxu1 %v1920_v7  ;;  %v170_v36 = vld [vmem:[#allocation3 + $0x48] sm:$0xff]  ;;  %v1940_v37 = vpack.c.bf16 %v282_v34, %v281_v32  ;;  %v284_v40 = vld [vmem:[#allocation6 + $0x78] sm:$0xff]  ;;  %v171_v41 = vld [vmem:[#allocation3 + $0x50] sm:$0xff] }
  0x53   :  { %1925 = vmatprep.subr.bf16.mxu1 %v1924_v10  ;;  %v1905_v39 = vpack.c.bf16 %v170_v36, %v169_v35  ;;  %v172_v42 = vld [vmem:[#allocation3 + $0x58] sm:$0xff]  ;;  %v1944_v43 = vpack.c.bf16 %v284_v40, %v283_v38  ;;  %v173_v45 = vld [vmem:[#allocation3 + $0x60] sm:$0xff]  ;;  %v174_v46 = vld [vmem:[#allocation3 + $0x68] sm:$0xff] }
  0x54   :  { %1897 = vmatpush3.bf16.msra.mxu0 %v1896_v21  ;;  %v1908_v44 = vpack.c.bf16 %v172_v42, %v171_v41  ;;  %v1911_v47 = vpack.c.bf16 %v174_v46, %v173_v45  ;;  %v175_v48 = vld [vmem:[#allocation3 + $0x70] sm:$0xff]  ;;  %v176_v49 = vld [vmem:[#allocation3 + $0x78] sm:$0xff]  ;;  %v371_v50 = vld [vmem:[#allocation8] sm:$0xff] }
  0x55   :  { %1898 = vmatprep.subr.bf16.mxu0 %v2239_v0  ;;  %v372_v51 = vld [vmem:[#allocation8 + $0x8] sm:$0xff]  ;;  %v1914_v53 = vpack.c.bf16 %v176_v49, %v175_v48  ;;  %v373_v55 = vld [vmem:[#allocation8 + $0x10] sm:$0xff]  ;;  %v374_v56 = vld [vmem:[#allocation8 + $0x18] sm:$0xff] }
  0x56   :  { %1927 = vmatpush3.bf16.msra.mxu1 %v1924_v10  ;;  %v268_v52 = vld [vmem:[%s2572_s3 + $0x8] sm:$0xff]  ;;  %v1948_v54 = vpack.c.bf16 %v372_v51, %v371_v50  ;;  %v158_v57 = vld [vmem:[%s2573_s4] sm:$0xff]  ;;  %v1952_v58 = vpack.c.bf16 %v374_v56, %v373_v55  ;;  %v377_v63 = vld [vmem:[#allocation8 + $0x30] sm:$0xff] }
  0x57   :  { %1929 = vmatprep.subr.bf16.mxu1 %v1928_v19  ;;  %v375_v59 = vld [vmem:[#allocation8 + $0x20] sm:$0xff]  ;;  %v376_v60 = vld [vmem:[#allocation8 + $0x28] sm:$0xff]  ;;  %v378_v2 = vld [vmem:[#allocation8 + $0x38] sm:$0xff] }
  0x58   :  { %1900 = vmatpush3.bf16.msra.mxu0 %v1899_v27  ;;  %v159_v61 = vld [vmem:[%s2573_s4 + $0x8] sm:$0xff]  ;;  %v1956_v62 = vpack.c.bf16 %v376_v60, %v375_v59  ;;  %v160_v3 = vld [vmem:[%s2573_s4 + $0x10] sm:$0xff]  ;;  %v1960_v4 = vpack.c.bf16 %v378_v2, %v377_v63  ;;  %v379_v5 = vld [vmem:[#allocation8 + $0x40] sm:$0xff]  ;;  %s1418_s4 = sshll.u32 %s2243_s5, 4  ;;  %s1419_s4 = int_to_ptr.vmem [resolvable:$true] %s1418_s4 }
  0x59   :  { %1901 = vmatprep.subr.bf16.mxu0 %v2239_v0  ;;  %v380_v6 = vld [vmem:[#allocation8 + $0x48] sm:$0xff]  ;;  %v381_v8 = vld [vmem:[#allocation8 + $0x50] sm:$0xff]  ;;  %v382_v9 = vld [vmem:[#allocation8 + $0x58] sm:$0xff]  ;;  %s2203_s28 = scalar_lea.vmem %s1419_s4, 128  ;;  %p2208_p5 = scmp.lt.s32.totalorder %s1419_s4, %s1419_s4 }
  0x5a   :  { %1931 = vmatpush3.bf16.msra.mxu1 %v1928_v19  ;;  %v1964_v7 = vpack.c.bf16 %v380_v6, %v379_v5  ;;  %v1968_v10 = vpack.c.bf16 %v382_v9, %v381_v8  ;;  %v383_v11 = vld [vmem:[#allocation8 + $0x60] sm:$0xff]  ;;  %v384_v12 = vld [vmem:[#allocation8 + $0x68] sm:$0xff]  ;;  %v385_v14 = vld [vmem:[#allocation8 + $0x70] sm:$0xff]  ;;  %v2242_v19 = vmov 0   ;;  %p2204_p4 = scmp.ne.s32.totalorder %s1419_s4, %s2203_s28  ;;  %p2209_p6 = scmp.lt.s32.totalorder %s2203_s28, %s2203_s28 }
  0x5b   :  { %1933 = vmatprep.subr.bf16.mxu1 %v1932_v25  ;;  %v1972_v13 = vpack.c.bf16 %v384_v12, %v383_v11  ;;  %v386_v15 = vld [vmem:[#allocation8 + $0x78] sm:$0xff]  ;;  %v104_v17 = vld [vmem:[%s2569_s0 + $0x10] sm:$0xff]  ;;  %v102_v18 = vld [vmem:[%s2569_s0] sm:$0xff]  ;;  %2114 = vset.pattern.permute.xlu1 %v2242_v19 }
  0x5c   :  { %1903 = vmatpush3.bf16.msra.mxu0 %v1902_v33  ;;  %v1976_v16 = vpack.c.bf16 %v386_v15, %v385_v14  ;;  %2113 = vset.pattern.permute.xlu0 %v2242_v19  ;;  %v123_v20 = vld [vmem:[%s2570_s1] sm:$0xff]  ;;  %v103_v21 = vld [vmem:[%s2569_s0 + $0x8] sm:$0xff]  ;;  %v125_v23 = vld [vmem:[%s2570_s1 + $0x10] sm:$0xff]  ;;  %p2210_p7 = por %p2209_p6, %p2208_p5 }
  0x5d   :  { %1904 = vmatprep.subr.bf16.mxu0 %v2239_v0  ;;  %112 = vperm.xlu1 %2114, %v104_v17   ;;  %v124_v22 = vld [vmem:[%s2570_s1 + $0x8] sm:$0xff]  ;;  %v144_v24 = vld [vmem:[%s2571_s2] sm:$0xff]  ;;  %v685_v2 = vld [vmem:[#allocation8 + $0x90] sm:$0xff] }
  0x5e   :  { %1935 = vmatpush3.bf16.msra.mxu1 %v1932_v25  ;;  %106 = vperm.xlu0 %2113, %v102_v18   ;;  %v145_v25 = vld [vmem:[%s2571_s2 + $0x8] sm:$0xff]  ;;  %v1438_v26 = vld [vmem:[%s2577_s8] ss:$0 sm:$0xff]  ;;  %v689_v9 = vld [vmem:[#allocation8 + $0xb0] sm:$0xff]  ;;  %p2211_p8 = pnand %p2210_p7, %p2204_p4 }
  0x5f   :  { %1937 = vmatprep.subr.bf16.mxu1 %v1936_v31  ;;  %v684_v63 = vld [vmem:[#allocation8 + $0x88] sm:$0xff]  ;;  %v687_v6 = vld [vmem:[#allocation8 + $0xa0] sm:$0xff]  ;;  %v693_v15 = vld [vmem:[#allocation8 + $0xd0] sm:$0xff] }
  0x60   :  { %1906 = vmatpush3.bf16.msra.mxu0 %v1905_v39  ;;  %v691_v12 = vld [vmem:[#allocation8 + $0xc0] sm:$0xff]  ;;  %v696_v19 = vld [vmem:[#allocation8 + $0xe8] sm:$0xff] }
  0x61   :  { %1907 = vmatprep.subr.bf16.mxu0 %v2239_v0  ;;  %127 = vperm.xlu1 %2114, %v123_v20   ;;  %v695_v18 = vld [vmem:[#allocation8 + $0xe0] sm:$0xff] }
  0x62   :  { %1939 = vmatpush3.bf16.msra.mxu1 %v1936_v31  ;;  %109 = vperm.xlu0 %2113, %v103_v21   ;;  %v2011_v20 = vpack.c.bf16 %v696_v19, %v695_v18  ;;  %v1437_v21 = vld [vmem:[%s2575_s6] ss:$0 sm:$0xff]  ;;  %v957_v19 = vld [vmem:[#allocation8 + $0x150] sm:$0xff] }
  0x63   :  { %1941 = vmatprep.subr.bf16.mxu1 %v1940_v37 }
  0x64   :  { %1909 = vmatpush3.bf16.msra.mxu0 %v1908_v44 }
  0x65   :  { %1910 = vmatprep.subr.bf16.mxu0 %v2239_v0  ;;  %133 = vperm.xlu1 %2114, %v125_v23  }
  0x66   :  { %1943 = vmatpush3.bf16.msra.mxu1 %v1940_v37  ;;  %130 = vperm.xlu0 %2113, %v124_v22   ;;  %v100_v37 = vlaneseq }
  0x67   :  { %1945 = vmatprep.subr.bf16.mxu1 %v1944_v43 }
  0x68   :  { %1912 = vmatpush3.bf16.msra.mxu0 %v1911_v47  ;;  %v101_v40 = vand.u32 127, %v100_v37 }
  0x69   :  { %1913 = vmatprep.subr.bf16.mxu0 %v2239_v0  ;;  %147 = vperm.xlu1 %2114, %v144_v24  }
  0x6a   :  { %1947 = vmatpush3.bf16.msra.mxu1 %v1944_v43 }
  0x6b   :  { %1980 = vmatprep.subr.bf16.mxu1 %v2239_v0 }
  0x6c   :  { %1915 = vmatpush3.bf16.msra.mxu0 %v1914_v53 }
  0x6d   :  { %1677 = vmatmul.mubr.f32.vlgmr.msra.gmra.mrb[0].mxu1 %v268_v52  ;;  %1949 = vmatprep.subr.bf16.mxu0 %v1948_v54  ;;  %v1439_v52 = vld [vmem:[%s2579_s10] ss:$0 sm:$0xff] }
  0x6e   :  { %1718 = vmatprep.mubr.msk.f32.mxu1 %vm2240_vm0, %v2241_v1  ;;  %150 = vperm.xlu1 %2114, %v145_v25  }
  0x6f   :  { %1636 = vmatmul.mubr.f32.vlgmr.msra.gmra.mrb[0].mxu0 %v158_v57 }
  0x70   :  { %1951 = vmatpush3.bf16.msra.mxu0 %v1948_v54  ;;  %1638 = vmatprep.mubr.msk.f32.mxu0 %vm2240_vm0, %v2241_v1 }
  0x71   :  { %1953 = vmatprep.subr.bf16.mxu0 %v1952_v58 }
  0x73   :  { %1639 = vmatmul.mubr.f32.gmra.mrb[2].mxu0 %v159_v61 }
  0x74   :  { %1955 = vmatpush3.bf16.msra.mxu0 %v1952_v58  ;;  %1641 = vmatprep.mubr.msk.f32.mxu0 %vm2240_vm0, %v2241_v1 }
  0x75   :  { %1957 = vmatprep.subr.bf16.mxu0 %v1956_v62 }
  0x77   :  { %1642 = vmatmul.mubr.f32.gmra.mrb[4].mxu0 %v160_v3 }
  0x78   :  { %1959 = vmatpush3.bf16.msra.mxu0 %v1956_v62  ;;  %v683_v62 = vld [vmem:[#allocation8 + $0x80] sm:$0xff] }
  0x79   :  { %1961 = vmatprep.subr.bf16.mxu0 %v1960_v4  ;;  %v1987_v3 = vpack.c.bf16 %v684_v63, %v683_v62 }
  0x7c   :  { %1963 = vmatpush3.bf16.msra.mxu0 %v1960_v4  ;;  %v686_v4 = vld [vmem:[#allocation8 + $0x98] sm:$0xff] }
  0x7d   :  { %1965 = vmatprep.subr.bf16.mxu0 %v1964_v7  ;;  %v1991_v5 = vpack.c.bf16 %v686_v4, %v685_v2  ;;  %v948_v4 = vld [vmem:[#allocation8 + $0x108] sm:$0xff] }
  0x80   :  { %1967 = vmatpush3.bf16.msra.mxu0 %v1964_v7  ;;  %v688_v7 = vld [vmem:[#allocation8 + $0xa8] sm:$0xff] }
  0x81   :  { %1969 = vmatprep.subr.bf16.mxu0 %v1968_v10  ;;  %v1995_v8 = vpack.c.bf16 %v688_v7, %v687_v6  ;;  %v949_v6 = vld [vmem:[#allocation8 + $0x110] sm:$0xff]  ;;  %v950_v7 = vld [vmem:[#allocation8 + $0x118] sm:$0xff] }
  0x84   :  { %1971 = vmatpush3.bf16.msra.mxu0 %v1968_v10  ;;  %v690_v10 = vld [vmem:[#allocation8 + $0xb8] sm:$0xff] }
  0x85   :  { %1973 = vmatprep.subr.bf16.mxu0 %v1972_v13  ;;  %v1999_v11 = vpack.c.bf16 %v690_v10, %v689_v9  ;;  %v2030_v9 = vpack.c.bf16 %v950_v7, %v949_v6  ;;  %v951_v10 = vld [vmem:[#allocation8 + $0x120] sm:$0xff]  ;;  %v1223_v6 = vld [vmem:[#allocation9 + $0x78] sm:$0xff] }
  0x88   :  { %1975 = vmatpush3.bf16.msra.mxu0 %v1972_v13  ;;  %v692_v13 = vld [vmem:[#allocation8 + $0xc8] sm:$0xff] }
  0x89   :  { %1977 = vmatprep.subr.bf16.mxu0 %v1976_v16  ;;  %v2003_v14 = vpack.c.bf16 %v692_v13, %v691_v12  ;;  %v953_v13 = vld [vmem:[#allocation8 + $0x130] sm:$0xff] }
  0x8c   :  { %1979 = vmatpush3.bf16.msra.mxu0 %v1976_v16  ;;  %v694_v16 = vld [vmem:[#allocation8 + $0xd8] sm:$0xff] }
  0x8d   :  { %v2007_v17 = vpack.c.bf16 %v694_v16, %v693_v15  ;;  %v955_v16 = vld [vmem:[#allocation8 + $0x140] sm:$0xff] }
  0xdc   :  { %v113_v38 = vpop.permute.xlu1 %112 }
  0xdd   :  { %v107_v39 = vpop.permute.xlu0 %106  ;;  %vm116_vm9 = vcmp.eq.s32.totalorder %v113_v38, %v101_v40 }
  0xde   :  { %vm114_vm6 = vcmp.eq.s32.totalorder %v107_v39, %v101_v40  ;;  %v2474_v60 = vsel %vm116_vm9, 1.0, %v2241_v1 }
  0xdf   :  { %v2462_v58 = vsel %vm114_vm6, 1.0, %v2241_v1 }
  0xe0   :  { %v128_v41 = vpop.permute.xlu1 %127 }
  0xe1   :  { %v110_v42 = vpop.permute.xlu0 %109  ;;  %vm135_vm1 = vcmp.eq.s32.totalorder %v128_v41, %v101_v40 }
  0xe2   :  { %v1432_v43 = vsel %vm135_vm1, 1.0, %v2241_v1  ;;  %vm115_vm8 = vcmp.eq.s32.totalorder %v110_v42, %v101_v40 }
  0xe3   :  { %562 = vxpose.xlu0.b32.start [1/3] (short) (narrow) %v1432_v43, 16  ;;  %v2469_v59 = vsel %vm115_vm8, 1.0, %v2241_v1 }
  0xe4   :  { %v134_v45 = vpop.permute.xlu1 %133 }
  0xe5   :  { %v131_v44 = vpop.permute.xlu0 %130  ;;  %vm137_vm3 = vcmp.eq.s32.totalorder %v134_v45, %v101_v40 }
  0xe6   :  { %vm136_vm2 = vcmp.eq.s32.totalorder %v131_v44, %v101_v40  ;;  %v1434_v47 = vsel %vm137_vm3, 1.0, %v2241_v1 }
  0xe7   :  { %v1433_v46 = vsel %vm136_vm2, 1.0, %v2241_v1 }
  0xe8   :  { %563 = vxpose.xlu0.b32.cont [2/3] (short) (narrow) %v1433_v46, 16  ;;  %v148_v48 = vpop.permute.xlu1 %147  ;;  %v1446_v46 = vld [vmem:[%s2579_s10 + $0x1] ss:$0 sm:$0xff] }
  0xe9   :  { %vm152_vm4 = vcmp.eq.s32.totalorder %v148_v48, %v101_v40 }
  0xea   :  { %v1435_v49 = vsel %vm152_vm4, 1.0, %v2241_v1 }
  0xeb   :  { %1306 = vxpose.xlu1.b32.start [1/2] (short) (narrow) %v1435_v49, 8 }
  0xec   :  { %564 = vxpose.xlu0.b32.end [3/3] (short) (narrow) %v1434_v47, 16 }
  0xed   :  { %v151_v50 = vpop.permute.xlu1 %150 }
  0xee   :  { %vm153_vm5 = vcmp.eq.s32.totalorder %v151_v50, %v101_v40  ;;  %v698_v40 = vld [vmem:[#allocation8 + $0xf8] sm:$0xff] }
  0xef   :  { %v1436_v51 = vsel %vm153_vm5, 1.0, %v2241_v1 }
  0xf0   :  { %1307 = vxpose.xlu1.b32.end [2/2] (short) (narrow) %v1436_v51, 8 }
 0x140   :  { %v1678_v27 = vpop.f32.mrb[0].mxu1 }
 0x141   :  { %v358_v28 = vpop.f32.mrb[1].mxu1  ;;  %v364_v30 = vadd.f32 %v1678_v27, %v1438_v26 }
 0x142   :  { %v359_v29 = vadd.f32 %v1438_v26, %v358_v28  ;;  %v2447_v31 = vpop.f32.mrb[0].mxu0 }
 0x143   :  { %v1637_v32 = vpop.f32.mrb[1].mxu0  ;;  %v251_v22 = vadd.f32 %v1437_v21, %v2447_v31 }
 0x144   :  { %1711 = vmatprep.mubr.f32.mxu0 %v359_v29 }
 0x145   :  { %1712 = vmatmul.mubr.f32.vlgmr.msra.gmra.mrb[6].mxu0 %v364_v30  ;;  %v2489_v26 = vmax.f32 %v251_v22, 0.0  ;;  %v959_v22 = vld [vmem:[#allocation8 + $0x160] sm:$0xff] }
 0x146   :  { %v2449_v33 = vpop.f32.mrb[2].mxu0 }
 0x147   :  { %v1640_v34 = vpop.f32.mrb[3].mxu0  ;;  %v256_v23 = vadd.f32 %v1437_v21, %v2449_v33 }
 0x149   :  { %v2491_v27 = vmax.f32 %v256_v23, 0.0  ;;  %v960_v23 = vld [vmem:[#allocation8 + $0x168] sm:$0xff] }
 0x14a   :  { %v2451_v35 = vpop.f32.mrb[4].mxu0 }
 0x14b   :  { %v1643_v36 = vpop.f32.mrb[5].mxu0  ;;  %v261_v28 = vadd.f32 %v1437_v21, %v2451_v35  ;;  %v697_v35 = vld [vmem:[#allocation8 + $0xf0] sm:$0xff] }
 0x14c   :  { %v2015_v41 = vpack.c.bf16 %v698_v40, %v697_v35 }
 0x14d   :  { %v2496_v36 = vmax.f32 %v261_v28, 0.0  ;;  %v962_v28 = vld [vmem:[#allocation8 + $0x178] sm:$0xff] }
 0x164   :  { %v2480_v61 = vpop.trf.xlu0 }
 0x165   :  { %1733 = vmatprep.mubr.msk.f32.mxu0 %vm594_vm10, %v2480_v61 }
 0x168   :  { %v2499_v39 = vpop.trf.xlu0 }
 0x218   :  { %v1713_v53 = vpop.f32.mrb[6].mxu0 }
 0x219   :  { %v466_v54 = vadd.f32 %v1713_v53, %v1439_v52  ;;  %v460_v55 = vpop.f32.mrb[7].mxu0 }
 0x21a   :  { %v461_v56 = vadd.f32 %v1439_v52, %v460_v55 }
 0x21c   :  { %v1981_v57 = vpack.c.bf16 %v466_v54, %v461_v56 }
 0x21e   :  { %1982 = vmatpush3.bf16.msra.mxu1 %v1981_v57 }
 0x21f   :  { %1988 = vmatprep.subr.bf16.mxu1 %v1987_v3 }
 0x221   :  { %1719 = vmatmul.mubr.msk.f32.vlgmr.msra.gmra.mrb[2].mxu1 %vm469_vm7, %v2462_v58 }
 0x222   :  { %1721 = vmatprep.mubr.msk.f32.mxu1 %vm2240_vm0, %v2241_v1  ;;  %1990 = vmatpush3.bf16.msra.mxu1 %v1987_v3  ;;  %v947_v3 = vld [vmem:[#allocation8 + $0x100] sm:$0xff] }
 0x223   :  { %1992 = vmatprep.subr.bf16.mxu1 %v1991_v5 }
 0x225   :  { %1722 = vmatmul.mubr.msk.f32.gmra.mrb[4].mxu1 %vm469_vm7, %v2469_v59 }
 0x226   :  { %1724 = vmatprep.mubr.msk.f32.mxu1 %vm2240_vm0, %v2241_v1  ;;  %1994 = vmatpush3.bf16.msra.mxu1 %v1991_v5 }
 0x227   :  { %1996 = vmatprep.subr.bf16.mxu1 %v1995_v8 }
 0x229   :  { %1725 = vmatmul.mubr.msk.f32.gmra.mrb[6].mxu1 %vm469_vm7, %v2474_v60 }
 0x22a   :  { %1998 = vmatpush3.bf16.msra.mxu1 %v1995_v8  ;;  %v2026_v8 = vpack.c.bf16 %v948_v4, %v947_v3  ;;  %v1221_v3 = vld [vmem:[#allocation9 + $0x68] sm:$0xff] }
 0x22b   :  { %2000 = vmatprep.subr.bf16.mxu1 %v1999_v11 }
 0x22e   :  { %2002 = vmatpush3.bf16.msra.mxu1 %v1999_v11  ;;  %v952_v11 = vld [vmem:[#allocation8 + $0x128] sm:$0xff] }
 0x22f   :  { %2004 = vmatprep.subr.bf16.mxu1 %v2003_v14  ;;  %v2034_v12 = vpack.c.bf16 %v952_v11, %v951_v10  ;;  %v1459_v10 = vld [vmem:[%s2581_s12] ss:$0 sm:$0xff] }
 0x232   :  { %2006 = vmatpush3.bf16.msra.mxu1 %v2003_v14  ;;  %v954_v14 = vld [vmem:[#allocation8 + $0x138] sm:$0xff] }
 0x233   :  { %2008 = vmatprep.subr.bf16.mxu1 %v2007_v17  ;;  %v2038_v15 = vpack.c.bf16 %v954_v14, %v953_v13 }
 0x236   :  { %2010 = vmatpush3.bf16.msra.mxu1 %v2007_v17  ;;  %v956_v17 = vld [vmem:[#allocation8 + $0x148] sm:$0xff] }
 0x237   :  { %2012 = vmatprep.subr.bf16.mxu1 %v2011_v20  ;;  %v2042_v18 = vpack.c.bf16 %v956_v17, %v955_v16  ;;  %v1322_v16 = vpop.trf.xlu1 }
 0x23a   :  { %2014 = vmatpush3.bf16.msra.mxu1 %v2011_v20  ;;  %v958_v20 = vld [vmem:[#allocation8 + $0x158] sm:$0xff] }
 0x23b   :  { %2016 = vmatprep.subr.bf16.mxu1 %v2015_v41  ;;  %v2046_v21 = vpack.c.bf16 %v958_v20, %v957_v19 }
 0x23e   :  { %2018 = vmatpush3.bf16.msra.mxu1 %v2015_v41 }
 0x23f   :  { %2100 = vmatprep.subr.bf16.mxu1 %v2239_v0 }
 0x2f4   :  { %v545_v24 = vpop.f32.mrb[2].mxu1 }
 0x2f5   :  { %v1720_v25 = vpop.f32.mrb[3].mxu1  ;;  %v559_v30 = vmul.f32 %v545_v24, %v2489_v26  ;;  %v2050_v24 = vpack.c.bf16 %v960_v23, %v959_v22 }
 0x2f6   :  { %v961_v25 = vld [vmem:[#allocation8 + $0x170] sm:$0xff] }
 0x2f8   :  { %v550_v29 = vpop.f32.mrb[4].mxu1 }
 0x2f9   :  { %v560_v32 = vmul.f32 %v550_v29, %v2491_v27  ;;  %v1723_v34 = vpop.f32.mrb[5].mxu1  ;;  %v2054_v29 = vpack.c.bf16 %v962_v28, %v961_v25 }
 0x2fb   :  { %v1983_v37 = vpack.c.bf16 %v560_v32, %v559_v30 }
 0x2fc   :  { %v555_v31 = vpop.f32.mrb[6].mxu1 }
 0x2fd   :  { %v561_v33 = vmul.f32 %v555_v31, %v2496_v36  ;;  %1984 = vmatprep.subr.bf16.mxu0 %v1983_v37  ;;  %v1726_v38 = vpop.f32.mrb[7].mxu1  ;;  %v1453_v31 = vld [vmem:[%s2579_s10 + $0x2] ss:$0 sm:$0xff] }
 0x2fe   :  { %1986 = vmatpush3.bf16.msra.mxu0 %v1983_v37 }
 0x2ff   :  { %1731 = vmatprep.subr.mxu0 %v561_v33 }
 0x302   :  { %1732 = vmatpush3.msra.mxu0 %v561_v33 }
 0x303   :  { %1734 = vmatmul.mubr.msk.f32.vlgmr.msra.gmra.mrb[8].mxu0 %vm594_vm10, %v2499_v39  ;;  %2019 = vmatprep.subr.bf16.mxu0 %v2239_v0 }
 0x304   :  { %1775 = vmatprep.mubr.msk.f32.mxu0 %vm2240_vm0, %v2241_v1 }
 0x3d6   :  { %v1735_v42 = vpop.f32.mrb[8].mxu0 }
 0x3d7   :  { %v667_v43 = vpop.f32.mrb[9].mxu0  ;;  %v677_v45 = vmax.f32 %v1735_v42, 0.0 }
 0x3d8   :  { %v676_v44 = vmax.f32 %v667_v43, 0.0 }
 0x3da   :  { %1768 = vmatprep.mubr.f32.mxu1 %v676_v44 }
 0x3db   :  { %1769 = vmatmul.mubr.f32.vlgmr.msra.gmra.mrb[8].mxu1 %v677_v45 }
 0x3dc   :  { %1781 = vmatprep.mubr.msk.f32.mxu1 %vm2240_vm0, %v2241_v1 }
 0x4ae   :  { %v1770_v47 = vpop.f32.mrb[8].mxu1 }
 0x4af   :  { %v779_v48 = vadd.f32 %v1770_v47, %v1446_v46  ;;  %v773_v49 = vpop.f32.mrb[9].mxu1 }
 0x4b0   :  { %v774_v50 = vadd.f32 %v1446_v46, %v773_v49 }
 0x4b2   :  { %v2020_v51 = vpack.c.bf16 %v779_v48, %v774_v50  ;;  %v1209_v48 = vld [vmem:[#allocation9 + $0x8] sm:$0xff]  ;;  %v1211_v50 = vld [vmem:[#allocation9 + $0x18] sm:$0xff] }
 0x4b4   :  { %2021 = vmatpush3.bf16.msra.mxu0 %v2020_v51  ;;  %2101 = vmatpush3.bf16.msra.mxu1 %v2020_v51 }
 0x4b5   :  { %2058 = vmatprep.subr.bf16.mxu1 %v2239_v0 }
 0x4b7   :  { %1776 = vmatmul.mubr.msk.f32.vlgmr.msra.gmra.mrb[10].mxu0 %vm469_vm7, %v2462_v58  ;;  %1782 = vmatmul.mubr.msk.f32.vlgmr.msra.gmra.mrb[10].mxu1 %vm469_vm7, %v2474_v60 }
 0x4b8   :  { %1778 = vmatprep.mubr.msk.f32.mxu0 %vm2240_vm0, %v2241_v1  ;;  %1832 = vmatprep.mubr.msk.f32.mxu1 %vm2240_vm0, %v2241_v1 }
 0x4bb   :  { %1779 = vmatmul.mubr.msk.f32.gmra.mrb[12].mxu0 %vm469_vm7, %v2469_v59 }
 0x4bc   :  { %1790 = vmatprep.mubr.msk.f32.mxu0 %vm594_vm10, %v2480_v61 }
 0x58a   :  { %v848_v52 = vpop.f32.mrb[10].mxu0  ;;  %v858_v53 = vpop.f32.mrb[10].mxu1 }
 0x58b   :  { %v1777_v54 = vpop.f32.mrb[11].mxu0  ;;  %v1783_v55 = vpop.f32.mrb[11].mxu1  ;;  %v862_v57 = vmul.f32 %v848_v52, %v2489_v26  ;;  %v864_v5 = vmul.f32 %v858_v53, %v2496_v36  ;;  %v1212_v52 = vld [vmem:[#allocation9 + $0x20] sm:$0xff]  ;;  %v1214_v53 = vld [vmem:[#allocation9 + $0x30] sm:$0xff] }
 0x58c   :  { %v1216_v55 = vld [vmem:[#allocation9 + $0x40] sm:$0xff] }
 0x58e   :  { %v853_v56 = vpop.f32.mrb[12].mxu0 }
 0x58f   :  { %v863_v62 = vmul.f32 %v853_v56, %v2491_v27  ;;  %v1780_v63 = vpop.f32.mrb[13].mxu0  ;;  %v1217_v56 = vld [vmem:[#allocation9 + $0x48] sm:$0xff] }
 0x590   :  { %v1219_v63 = vld [vmem:[#allocation9 + $0x58] sm:$0xff] }
 0x591   :  { %v2022_v2 = vpack.c.bf16 %v863_v62, %v862_v57  ;;  %v2081_v57 = vpack.c.bf16 %v1217_v56, %v1216_v55  ;;  %v1218_v62 = vld [vmem:[#allocation9 + $0x50] sm:$0xff] }
 0x593   :  { %2023 = vmatprep.subr.bf16.mxu0 %v2022_v2 }
 0x594   :  { %2025 = vmatpush3.bf16.msra.mxu0 %v2022_v2  ;;  %v2085_v2 = vpack.c.bf16 %v1219_v63, %v1218_v62 }
 0x595   :  { %1788 = vmatprep.subr.mxu0 %v864_v5 }
 0x598   :  { %1789 = vmatpush3.msra.mxu0 %v864_v5  ;;  %v1222_v5 = vld [vmem:[#allocation9 + $0x70] sm:$0xff] }
 0x599   :  { %1791 = vmatmul.mubr.msk.f32.vlgmr.msra.gmra.mrb[14].mxu0 %vm594_vm10, %v2499_v39  ;;  %2027 = vmatprep.subr.bf16.mxu0 %v2026_v8  ;;  %v2093_v7 = vpack.c.bf16 %v1223_v6, %v1222_v5 }
 0x59a   :  { %2029 = vmatpush3.bf16.msra.mxu0 %v2026_v8 }
 0x59b   :  { %2031 = vmatprep.subr.bf16.mxu0 %v2030_v9 }
 0x59e   :  { %2033 = vmatpush3.bf16.msra.mxu0 %v2030_v9 }
 0x59f   :  { %2035 = vmatprep.subr.bf16.mxu0 %v2034_v12 }
 0x5a2   :  { %2037 = vmatpush3.bf16.msra.mxu0 %v2034_v12 }
 0x5a3   :  { %2039 = vmatprep.subr.bf16.mxu0 %v2038_v15 }
 0x5a6   :  { %2041 = vmatpush3.bf16.msra.mxu0 %v2038_v15 }
 0x5a7   :  { %2043 = vmatprep.subr.bf16.mxu0 %v2042_v18 }
 0x5aa   :  { %2045 = vmatpush3.bf16.msra.mxu0 %v2042_v18 }
 0x5ab   :  { %2047 = vmatprep.subr.bf16.mxu0 %v2046_v21 }
 0x5ae   :  { %2049 = vmatpush3.bf16.msra.mxu0 %v2046_v21 }
 0x5af   :  { %2051 = vmatprep.subr.bf16.mxu0 %v2050_v24 }
 0x5b2   :  { %2053 = vmatpush3.bf16.msra.mxu0 %v2050_v24 }
 0x5b3   :  { %2055 = vmatprep.subr.bf16.mxu0 %v2054_v29 }
 0x5b6   :  { %2057 = vmatpush3.bf16.msra.mxu0 %v2054_v29 }
 0x5b7   :  { %2097 = vmatprep.subr.bf16.mxu0 %v2239_v0 }
 0x66c   :  { %v1792_v30 = vpop.f32.mrb[14].mxu0 }
 0x66d   :  { %v931_v32 = vpop.f32.mrb[15].mxu0  ;;  %v941_v37 = vmax.f32 %v1792_v30, 0.0 }
 0x66e   :  { %v940_v34 = vmax.f32 %v931_v32, 0.0 }
 0x670   :  { %1825 = vmatprep.mubr.f32.mxu0 %v940_v34 }
 0x671   :  { %1826 = vmatmul.mubr.f32.vlgmr.msra.gmra.mrb[16].mxu0 %v941_v37 }
 0x672   :  { %1889 = vmatprep.mubr.msk.f32.mxu0 %vm2240_vm0, %v2241_v1 }
 0x744   :  { %v1827_v33 = vpop.f32.mrb[16].mxu0 }
 0x745   :  { %v1043_v38 = vadd.f32 %v1827_v33, %v1453_v31  ;;  %v1037_v35 = vpop.f32.mrb[17].mxu0 }
 0x746   :  { %v1038_v40 = vadd.f32 %v1453_v31, %v1037_v35 }
 0x748   :  { %v2059_v41 = vpack.c.bf16 %v1043_v38, %v1038_v40 }
 0x74a   :  { %2060 = vmatpush3.bf16.msra.mxu1 %v2059_v41 }
 0x74d   :  { %1833 = vmatmul.mubr.msk.f32.vlgmr.msra.gmra.mrb[12].mxu1 %vm469_vm7, %v2462_v58 }
 0x74e   :  { %1835 = vmatprep.mubr.msk.f32.mxu1 %vm2240_vm0, %v2241_v1 }
 0x751   :  { %1836 = vmatmul.mubr.msk.f32.gmra.mrb[14].mxu1 %vm469_vm7, %v2469_v59  ;;  %v1208_v59 = vld [vmem:[#allocation9] sm:$0xff] }
 0x752   :  { %1838 = vmatprep.mubr.msk.f32.mxu1 %vm2240_vm0, %v2241_v1 }
 0x755   :  { %1839 = vmatmul.mubr.msk.f32.gmra.mrb[16].mxu1 %vm469_vm7, %v2474_v60  ;;  %v1210_v60 = vld [vmem:[#allocation9 + $0x10] sm:$0xff] }
 0x756   :  { %1847 = vmatprep.mubr.msk.f32.mxu1 %vm594_vm10, %v2480_v61  ;;  %v2065_v61 = vpack.c.bf16 %v1209_v48, %v1208_v59  ;;  %v2069_v51 = vpack.c.bf16 %v1211_v50, %v1210_v60 }
 0x820   :  { %v1112_v0 = vpop.f32.mrb[12].mxu1 }
 0x821   :  { %v1834_v42 = vpop.f32.mrb[13].mxu1  ;;  %v1126_v58 = vmul.f32 %v1112_v0, %v2489_v26  ;;  %v1213_v26 = vld [vmem:[#allocation9 + $0x28] sm:$0xff] }
 0x824   :  { %v1117_v43 = vpop.f32.mrb[14].mxu1 }
 0x825   :  { %v1127_v44 = vmul.f32 %v1117_v43, %v2491_v27  ;;  %v1837_v45 = vpop.f32.mrb[15].mxu1  ;;  %v2073_v27 = vpack.c.bf16 %v1213_v26, %v1212_v52 }
 0x827   :  { %v2061_v46 = vpack.c.bf16 %v1127_v44, %v1126_v58 }
 0x828   :  { %v1122_v47 = vpop.f32.mrb[16].mxu1 }
 0x829   :  { %v1128_v1 = vmul.f32 %v1122_v47, %v2496_v36  ;;  %v1840_v49 = vpop.f32.mrb[17].mxu1  ;;  %2062 = vmatprep.subr.bf16.mxu1 %v2061_v46  ;;  %v1215_v36 = vld [vmem:[#allocation9 + $0x38] sm:$0xff] }
 0x82a   :  { %2064 = vmatpush3.bf16.msra.mxu1 %v2061_v46  ;;  %v2077_v54 = vpack.c.bf16 %v1215_v36, %v1214_v53 }
 0x82b   :  { %1845 = vmatprep.subr.mxu1 %v1128_v1 }
 0x82e   :  { %1846 = vmatpush3.msra.mxu1 %v1128_v1 }
 0x82f   :  { %1848 = vmatmul.mubr.msk.f32.vlgmr.msra.gmra.mrb[18].mxu1 %vm594_vm10, %v2499_v39  ;;  %2066 = vmatprep.subr.bf16.mxu1 %v2065_v61  ;;  %v1220_v39 = vld [vmem:[#allocation9 + $0x60] sm:$0xff] }
 0x830   :  { %2068 = vmatpush3.bf16.msra.mxu1 %v2065_v61  ;;  %v2089_v4 = vpack.c.bf16 %v1221_v3, %v1220_v39 }
 0x831   :  { %2070 = vmatprep.subr.bf16.mxu1 %v2069_v51 }
 0x834   :  { %2072 = vmatpush3.bf16.msra.mxu1 %v2069_v51 }
 0x835   :  { %2074 = vmatprep.subr.bf16.mxu1 %v2073_v27 }
 0x838   :  { %2076 = vmatpush3.bf16.msra.mxu1 %v2073_v27 }
 0x839   :  { %2078 = vmatprep.subr.bf16.mxu1 %v2077_v54 }
 0x83c   :  { %2080 = vmatpush3.bf16.msra.mxu1 %v2077_v54 }
 0x83d   :  { %2082 = vmatprep.subr.bf16.mxu1 %v2081_v57 }
 0x840   :  { %2084 = vmatpush3.bf16.msra.mxu1 %v2081_v57 }
 0x841   :  { %2086 = vmatprep.subr.bf16.mxu1 %v2085_v2 }
 0x844   :  { %2088 = vmatpush3.bf16.msra.mxu1 %v2085_v2 }
 0x845   :  { %2090 = vmatprep.subr.bf16.mxu1 %v2089_v4 }
 0x848   :  { %2092 = vmatpush3.bf16.msra.mxu1 %v2089_v4 }
 0x849   :  { %2094 = vmatprep.subr.bf16.mxu1 %v2093_v7 }
 0x84c   :  { %2096 = vmatpush3.bf16.msra.mxu1 %v2093_v7 }
 0x902   :  { %v1849_v8 = vpop.f32.mrb[18].mxu1 }
 0x903   :  { %v1195_v9 = vpop.f32.mrb[19].mxu1 }
 0x904   :  { %1882 = vmatprep.mubr.f32.mxu1 %v1195_v9 }
 0x905   :  { %1883 = vmatmul.mubr.f32.vlgmr.msra.gmra.mrb[20].mxu1 %v1849_v8 }
 0x9d8   :  { %v1884_v11 = vpop.f32.mrb[20].mxu1 }
 0x9d9   :  { %v1303_v12 = vadd.f32 %v1884_v11, %v1459_v10  ;;  %v1297_v13 = vpop.f32.mrb[21].mxu1 }
 0x9da   :  { %v1298_v14 = vadd.f32 %v1459_v10, %v1297_v13 }
 0x9dc   :  { %v2098_v15 = vpack.c.bf16 %v1303_v12, %v1298_v14 }
 0x9de   :  { %2099 = vmatpush3.bf16.msra.mxu0 %v2098_v15 }
 0x9e1   :  { %1890 = vmatmul.mubr.msk.f32.vlgmr.msra.gmra.mrb[18].mxu0 %vm469_vm7, %v1322_v16 }
 0xab4   :  { %v1407_v17 = vpop.f32.mrb[18].mxu0 }
 0xab5   :  { %1411 = vst [vmem:[#allocation11] sm:$0xff] %v1407_v17  ;;  %v1891_v18 = vpop.f32.mrb[19].mxu0 }
 0xab6   :  { %2214 = shalt.err (!%p2211_p8)
}
 0xab7   :  { %s2215_s16 = scalar_lea.hbm %s2582_s13, 128 }
 0xab8   :  { %p2216_p9 = scmp.ne.s32.totalorder %s2582_s13, %s2215_s16  ;;  %p2219_p10 = scmp.lt.u32.totalorder %s2215_s16, %s2582_s13 }
 0xaba   :  { %p2221_p11 = pnand %p2219_p10, %p2216_p9 }
 0xabc   :  { %2224 = shalt.err (!%p2221_p11)
}
 0xabd   :  { %1421 = dma.vmem_to_hbm [thread:$0]  %s1419_s4, 128, %s2582_s13, [#allocation5]  }
 0xabe   :  { %2231 = dma.done.wait [#allocation5], 128  }
 0xabf   :  { %2232 = vsyncadd [#allocation5], 4294967168 }
 0xac0   :  { %1425 = vsyncpa [#allocation4], 1 }
 0xac1   :  { %1426 = vsyncpa [#allocation7], 1 }
 0xac2   :  { %1427 = vsyncpa [#allocation10], 1 }
 0xac3   :  { %1428 = vsyncpa [#allocation5], 1 }

</bundles_post_ra>
